<compile_context>
chip_gen: v5e
topology: v5e:2x2
jax: 0.10.0
libtpu: 0.0.40
codegen_flags: <defaults>
</compile_context>

<pallas_src>
import math

import jax
import jax.numpy as jnp
from jax import lax
from jax.experimental import pallas as pl
from jax.experimental.pallas import tpu as pltpu


_INV_SQRT2 = 1.0 / math.sqrt(2.0)


def _gelu(h):
    # Exact erf-based GELU (matches torch.nn.GELU default); math kept in f32.
    return 0.5 * h * (1.0 + lax.erf(h * _INV_SQRT2))


def _round_up(a, b):
    return ((a + b - 1) // b) * b


# --------------------------------------------------------------------------- #
# Kernels
# --------------------------------------------------------------------------- #
def _mlp_kernel_resident(x_ref, w0_ref, b0_ref, w1_ref, b1_ref, o_ref):
    # grid = (row tiles,) ; W0/W1/b0/b1 have constant index maps (VMEM-resident).
    h = jnp.dot(x_ref[...], w0_ref[...], preferred_element_type=jnp.float32)
    h = _gelu(h + b0_ref[...])
    out = jnp.dot(h.astype(w1_ref.dtype), w1_ref[...],
                  preferred_element_type=jnp.float32)
    o_ref[...] = (out + b1_ref[...]).astype(o_ref.dtype)


def _mlp_kernel_streamed(x_ref, w0_ref, b0_ref, w1_ref, b1_ref, o_ref, acc_ref):
    # grid = (row tiles [parallel], ff tiles [arbitrary, innermost]).
    # x_ref: (tm, H), w0_ref: (H, tf), b0_ref: (1, tf), w1_ref: (tf, H),
    # b1_ref: (1, H), o_ref: (tm, H), acc_ref: (tm, H) f32 scratch.
    f = pl.program_id(1)

    @pl.when(f == 0)
    def _():
        # Fold the fc1 bias into the accumulator init (no epilogue add needed).
        acc_ref[...] = jnp.broadcast_to(b1_ref[...], acc_ref.shape)

    # fc0 slice: (tm, H) @ (H, tf) -> (tm, tf), f32 accumulation on the MXU.
    h = jnp.dot(x_ref[...], w0_ref[...], preferred_element_type=jnp.float32)
    h = _gelu(h + b0_ref[...])
    # fc1 partial: (tm, tf) @ (tf, H) accumulated into the f32 scratch.
    acc_ref[...] += jnp.dot(h.astype(w1_ref.dtype), w1_ref[...],
                            preferred_element_type=jnp.float32)

    @pl.when(f == pl.num_programs(1) - 1)
    def _():
        o_ref[...] = acc_ref[...].astype(o_ref.dtype)


# --------------------------------------------------------------------------- #
# Sizing helpers
# --------------------------------------------------------------------------- #
def _vmem_capacity_bytes():
    try:
        info = pltpu.get_tpu_info()
        cap = int(getattr(info, "vmem_capacity_bytes", 0))
        if cap > 0:
            return cap
    except Exception:
        pass
    return 64 * 1024 * 1024          # conservative fallback (v7x per-TC size)


def _est_resident(tm, H, F, in_b, out_b):
    return (2 * tm * H * in_b                    # x (double-buffered)
            + 2 * (H * F + F * H) * in_b         # W0 + W1 (2 buffers each)
            + 2 * (F + H) * 4                    # b0 + b1 (f32)
            + 2 * tm * H * out_b                 # output (double-buffered)
            + 3 * tm * F * 4)                    # f32 fc0/GELU temporaries


def _est_streamed(tm, tf, H, in_b, out_b):
    return (2 * tm * H * in_b                    # x (double-buffered)
            + 2 * (H * tf + tf * H) * in_b       # streamed W0/W1 slices
            + 2 * (tf + H) * 4                   # b0 slice + b1 (f32)
            + 2 * tm * H * out_b                 # output (double-buffered)
            + tm * H * 4                         # f32 accumulator scratch
            + 2 * tm * tf * 4)                   # f32 fc0/GELU temporaries


def _initial_tm(M, tm_user, row_align):
    Mr = _round_up(M, row_align)
    if tm_user is not None:
        return max(row_align, min(_round_up(tm_user, row_align), Mr))
    tm = min(512, Mr)
    # v7x megacore: give the "parallel" row axis >= 2 tiles whenever M allows.
    if Mr > row_align and -(-M // tm) < 2:
        tm = _round_up(-(-M // 2), row_align)
    return tm


def _even_split(M, tm, row_align):
    # Rebalance the row tile so padding is minimized for the same tile count.
    n = -(-M // tm)
    return _round_up(-(-M // n), row_align)


# --------------------------------------------------------------------------- #
# Params
# --------------------------------------------------------------------------- #
def prepare_params(w0_t, b0, w1_t, b1, *, mm_dtype=jnp.bfloat16, ff_multiple=128):
    """One-time weight prep (cast + FF padding) hoisted out of the per-call path.

    Zero FF padding is exact: gelu(0 + 0) = 0 multiplies zero rows of W1.
    """
    F = w0_t.shape[1]
    Fp = _round_up(F, ff_multiple)
    w0 = w0_t.astype(mm_dtype)
    w1 = w1_t.astype(mm_dtype)
    b0f = b0.astype(jnp.float32)
    if Fp != F:
        w0 = jnp.pad(w0, ((0, 0), (0, Fp - F)))
        w1 = jnp.pad(w1, ((0, Fp - F), (0, 0)))
        b0f = jnp.pad(b0f, (0, Fp - F))
    return w0, b0f, w1, b1.astype(jnp.float32)


def init_params(key, hidden_dim, ff_dim, dtype=jnp.float32):
    """Deterministic init mimicking nn.Linear's uniform(-1/sqrt(fan_in), ...)."""
    k0, k1, k2, k3 = jax.random.split(key, 4)
    bound0 = 1.0 / math.sqrt(hidden_dim)
    bound1 = 1.0 / math.sqrt(ff_dim)
    # weights stored pre-transposed: (in, out)
    w0_t = jax.random.uniform(k0, (hidden_dim, ff_dim), dtype, -bound0, bound0)
    b0 = jax.random.uniform(k1, (ff_dim,), dtype, -bound0, bound0)
    w1_t = jax.random.uniform(k2, (ff_dim, hidden_dim), dtype, -bound1, bound1)
    b1 = jax.random.uniform(k3, (hidden_dim,), dtype, -bound1, bound1)
    return w0_t, b0, w1_t, b1


# --------------------------------------------------------------------------- #
# Wrapper
# --------------------------------------------------------------------------- #
def mlp_block(x, w0_t, b0, w1_t, b1, *, tm=None, tf=None, use_bf16=True,
              out_dtype=None, weights_resident=None, vmem_limit_bytes=None):
    """Fused fc0 -> GELU -> fc1.

    x: (batch, seq, hidden); w0_t: (hidden, ff); b0: (ff,); w1_t: (ff, hidden);
    b1: (hidden,).  Weights are pre-transposed (in, out).  Pass them through
    `prepare_params()` once so the per-call path has no cast/pad ops.
    """
    B, S, H = x.shape
    F = w0_t.shape[1]
    M = B * S
    if out_dtype is None:
        out_dtype = x.dtype
    mm_dtype = jnp.bfloat16 if use_bf16 else x.dtype
    in_b = jnp.dtype(mm_dtype).itemsize
    out_b = jnp.dtype(out_dtype).itemsize
    row_align = 16 if in_b < 4 else 8      # bf16 sublane tile is 16

    # --- VMEM budget (per generation; no hard 64 MiB cap) --------------------
    cap = _vmem_capacity_bytes()
    if vmem_limit_bytes is None:
        vmem_limit_bytes = max(32 * 1024 * 1024, (cap * 15) // 16)
    vmem_limit_bytes = int(min(vmem_limit_bytes, cap))
    budget = int(vmem_limit_bytes * 0.9)   # selection margin for estimate error

    # --- path choice ----------------------------------------------------------
    resident_weight_bytes = 2 * (H * F + F * H) * in_b + 2 * (F + H) * 4
    if weights_resident is None:
        weights_resident = resident_weight_bytes <= int(budget * 0.55)

    # --- dtype plumbing (Python-level checks: no-ops for prepared params) ----
    x2 = x.reshape(M, H)
    if x2.dtype != mm_dtype:
        x2 = x2.astype(mm_dtype)
    w0 = w0_t if w0_t.dtype == mm_dtype else w0_t.astype(mm_dtype)
    w1 = w1_t if w1_t.dtype == mm_dtype else w1_t.astype(mm_dtype)
    b0_2 = (b0 if b0.dtype == jnp.float32 else b0.astype(jnp.float32)).reshape(1, F)
    b1_2 = (b1 if b1.dtype == jnp.float32 else b1.astype(jnp.float32)).reshape(1, H)

    flops = int(4 * M * H * F)
    trans = int(M * F)

    if weights_resident:
        # ------------------- resident-weight fast path -----------------------
        tm_ = _initial_tm(M, tm, row_align)
        if tm is None:
            while tm_ > row_align and _est_resident(tm_, H, F, in_b, out_b) > budget:
                tm_ = _round_up(max(row_align, tm_ // 2), row_align)
            tm_ = _even_split(M, tm_, row_align)
        Mp = _round_up(M, tm_)
        if Mp != M:
            x2 = jnp.pad(x2, ((0, Mp - M), (0, 0)))
        grid = (Mp // tm_,)
        cost = pl.CostEstimate(
            flops=flops, transcendentals=trans,
            bytes_accessed=int(M * H * (in_b + out_b)
                               + 2 * H * F * in_b + (F + H) * 4))
        out2 = pl.pallas_call(
            _mlp_kernel_resident,
            out_shape=jax.ShapeDtypeStruct((Mp, H), out_dtype),
            grid_spec=pltpu.PrefetchScalarGridSpec(
                num_scalar_prefetch=0,
                grid=grid,
                in_specs=[
                    pl.BlockSpec((tm_, H), lambda i: (i, 0)),  # x row tile
                    pl.BlockSpec((H, F), lambda i: (0, 0)),    # W0^T resident
                    pl.BlockSpec((1, F), lambda i: (0, 0)),    # b0
                    pl.BlockSpec((F, H), lambda i: (0, 0)),    # W1^T resident
                    pl.BlockSpec((1, H), lambda i: (0, 0)),    # b1
                ],
                out_specs=pl.BlockSpec((tm_, H), lambda i: (i, 0)),
            ),
            compiler_params=pltpu.CompilerParams(
                dimension_semantics=("parallel",),
                vmem_limit_bytes=vmem_limit_bytes),
            cost_estimate=cost,
        )(x2, w0, b0_2, w1, b1_2)
    else:
        # ------------------- streamed-FF (large weights) path ----------------
        tm_ = _initial_tm(M, tm, row_align)
        Fr = _round_up(F, 128)
        tf_ = _round_up(min(tf if tf is not None else 512, Fr), 128)
        tf_floor = 256 if (in_b <= 2 and Fr >= 256) else 128  # keep DMA rows >= 512 B
        if tm is None or tf is None:
            # Shrink the FF tile before the row tile: intensity scales with tm.
            while _est_streamed(tm_, tf_, H, in_b, out_b) > budget:
                if tf is None and tf_ > tf_floor:
                    tf_ = max(tf_floor, _round_up(tf_ // 2, 128))
                elif tm is None and tm_ > row_align:
                    tm_ = _round_up(max(row_align, tm_ // 2), row_align)
                else:
                    break
        if tm is None:
            tm_ = _even_split(M, tm_, row_align)
        Fp = _round_up(F, tf_)
        Mp = _round_up(M, tm_)
        if Mp != M:
            x2 = jnp.pad(x2, ((0, Mp - M), (0, 0)))
        if Fp != F:
            # Exact: gelu(0 + 0) = 0 columns hit zero rows of W1.
            w0 = jnp.pad(w0, ((0, 0), (0, Fp - F)))
            w1 = jnp.pad(w1, ((0, Fp - F), (0, 0)))
            b0_2 = jnp.pad(b0_2, ((0, 0), (0, Fp - F)))
        grid = (Mp // tm_, Fp // tf_)
        cost = pl.CostEstimate(
            flops=flops, transcendentals=trans,
            bytes_accessed=int(Mp * H * (in_b + out_b)
                               + grid[0] * (2 * H * Fp * in_b + Fp * 4) + H * 4))
        out2 = pl.pallas_call(
            _mlp_kernel_streamed,
            out_shape=jax.ShapeDtypeStruct((Mp, H), out_dtype),
            grid_spec=pltpu.PrefetchScalarGridSpec(
                num_scalar_prefetch=0,
                grid=grid,
                in_specs=[
                    pl.BlockSpec((tm_, H), lambda i, f: (i, 0)),   # x row tile
                    pl.BlockSpec((H, tf_), lambda i, f: (0, f)),   # W0^T slice
                    pl.BlockSpec((1, tf_), lambda i, f: (0, f)),   # b0 slice
                    pl.BlockSpec((tf_, H), lambda i, f: (f, 0)),   # W1^T slice
                    pl.BlockSpec((1, H), lambda i, f: (0, 0)),     # b1
                ],
                out_specs=pl.BlockSpec((tm_, H), lambda i, f: (i, 0)),
                scratch_shapes=[pltpu.VMEM((tm_, H), jnp.float32)],
            ),
            compiler_params=pltpu.CompilerParams(
                dimension_semantics=("parallel", "arbitrary"),
                vmem_limit_bytes=vmem_limit_bytes),
            cost_estimate=cost,
        )(x2, w0, b0_2, w1, b1_2)

    if Mp != M:
        out2 = out2[:M]
    return out2.reshape(B, S, H)


# --------------------------------------------------------------------------- #
# Reference + tests
# --------------------------------------------------------------------------- #
def mlp_block_ref(x, w0_t, b0, w1_t, b1):
    h = jnp.einsum("bsh,hf->bsf", x, w0_t, precision=lax.Precision.HIGHEST) + b0
    h = _gelu(h)
    return jnp.einsum("bsf,fh->bsh", h, w1_t, precision=lax.Precision.HIGHEST) + b1


if __name__ == "__main__":
    key = jax.random.PRNGKey(0)
    k1, k2, k3, k4 = jax.random.split(key, 4)
    cast = lambda a: a.astype(jnp.bfloat16).astype(jnp.float32)

    # --- small shape consistent with the module -------------------------------
    batch, seq, hidden_dim, ff_dim = 2, 8, 32, 64
    x = jax.random.normal(k1, (batch, seq, hidden_dim), dtype=jnp.float32)
    params = init_params(k2, hidden_dim, ff_dim)

    # exact f32 path must match the reference tightly
    out_f32 = jax.block_until_ready(mlp_block(x, *params, use_bf16=False))
    ref = mlp_block_ref(x, *params)
    assert out_f32.shape == (batch, seq, hidden_dim)
    assert jnp.allclose(out_f32, ref, atol=1e-5, rtol=1e-5), "f32 small-shape mismatch"

    # default bf16 MXU path vs a bf16-cast reference
    out_bf = jax.block_until_ready(mlp_block(x, *params))
    ref_bf = mlp_block_ref(cast(x), cast(params[0]), params[1],
                           cast(params[2]), params[3])
    assert jnp.allclose(out_bf, ref_bf, atol=2e-2, rtol=2e-2), "bf16 small-shape mismatch"

    # --- larger shape: prepared bf16 weights, resident & streamed paths -------
    b2, s2, h2, f2 = 4, 100, 256, 384          # M=400 (ragged rows), F=384
    x_big = jax.random.normal(k3, (b2, s2, h2), dtype=jnp.float32)
    raw_big = init_params(k4, h2, f2)
    prep_big = prepare_params(*raw_big)        # one-time bf16 cast, lane-aligned FF
    ref_big = mlp_block_ref(cast(x_big), cast(raw_big[0]), raw_big[1],
                            cast(raw_big[2]), raw_big[3])

    # auto path (weights are small -> VMEM-resident fast path)
    out_res = jax.block_until_ready(mlp_block(x_big, *prep_big))
    assert jnp.allclose(out_res, ref_big, atol=2e-2, rtol=2e-2), "resident path mismatch"

    # forced streamed path: exercises row tiling, FF accumulation and padding
    out_str = jax.block_until_ready(
        mlp_block(x_big, *prep_big, weights_resident=False, tm=128, tf=256))
    assert jnp.allclose(out_str, ref_big, atol=2e-2, rtol=2e-2), "streamed path mismatch"

    print("KERNEL_OK")
</pallas_src>

<mosaic_0001>
module attributes {stable_mosaic.version = 11 : i64} {
  func.func @_mlp_kernel_resident(%arg0: i32, %arg1: memref<8x32xf32, #tpu.memory_space<vmem>>, %arg2: memref<32x64xf32, #tpu.memory_space<vmem>>, %arg3: memref<1x64xf32, #tpu.memory_space<vmem>>, %arg4: memref<64x32xf32, #tpu.memory_space<vmem>>, %arg5: memref<1x32xf32, #tpu.memory_space<vmem>>, %arg6: memref<8x32xf32, #tpu.memory_space<vmem>>) attributes {dimension_semantics = [#tpu.dimension_semantics<parallel>], iteration_bounds = array<i64: 2>, scalar_prefetch = 0 : i64, scratch_operands = 0 : i64, tpu.core_type = #tpu.core_type<tc>, window_params = [{transform_indices = @transform_0, window_bounds = array<i64: 8, 32>}, {pipeline_mode = #tpu.pipeline_mode<synchronous>, transform_indices = @transform_1, window_bounds = array<i64: 32, 64>}, {pipeline_mode = #tpu.pipeline_mode<synchronous>, transform_indices = @transform_2, window_bounds = array<i64: 1, 64>}, {pipeline_mode = #tpu.pipeline_mode<synchronous>, transform_indices = @transform_3, window_bounds = array<i64: 64, 32>}, {pipeline_mode = #tpu.pipeline_mode<synchronous>, transform_indices = @transform_4, window_bounds = array<i64: 1, 32>}, {transform_indices = @transform_5, window_bounds = array<i64: 8, 32>}]} {
    %c0 = arith.constant 0 : index
    %c0_0 = arith.constant 0 : index
    %0 = vector.load %arg1[%c0, %c0_0] : memref<8x32xf32, #tpu.memory_space<vmem>>, vector<8x32xf32>
    %c0_1 = arith.constant 0 : index
    %c0_2 = arith.constant 0 : index
    %1 = vector.load %arg2[%c0_1, %c0_2] : memref<32x64xf32, #tpu.memory_space<vmem>>, vector<32x64xf32>
    %cst = arith.constant dense<0.000000e+00> : vector<8x64xf32>
    %2 = tpu.matmul %0, %1, %cst {dimension_numbers = #tpu.dot_dimension_numbers<[1], [0], [0], [1], [0, 0, 1, 1], [], []>} : vector<8x32xf32>, vector<32x64xf32>, vector<8x64xf32> -> vector<8x64xf32>
    %c0_3 = arith.constant 0 : index
    %c0_4 = arith.constant 0 : index
    %3 = vector.load %arg3[%c0_3, %c0_4] : memref<1x64xf32, #tpu.memory_space<vmem>>, vector<1x64xf32>
    %4 = vector.broadcast %3 : vector<1x64xf32> to vector<8x64xf32>
    %5 = arith.addf %2, %4 : vector<8x64xf32>
    %cst_5 = arith.constant 5.000000e-01 : f32
    %6 = vector.broadcast %cst_5 : f32 to vector<8x64xf32>
    %7 = arith.mulf %6, %5 : vector<8x64xf32>
    %cst_6 = arith.constant 0.707106769 : f32
    %8 = vector.broadcast %cst_6 : f32 to vector<8x64xf32>
    %9 = arith.mulf %5, %8 : vector<8x64xf32>
    %10 = math.erf %9 : vector<8x64xf32>
    %cst_7 = arith.constant 1.000000e+00 : f32
    %11 = vector.broadcast %cst_7 : f32 to vector<8x64xf32>
    %12 = arith.addf %11, %10 : vector<8x64xf32>
    %13 = arith.mulf %7, %12 : vector<8x64xf32>
    %c0_8 = arith.constant 0 : index
    %c0_9 = arith.constant 0 : index
    %14 = vector.load %arg4[%c0_8, %c0_9] : memref<64x32xf32, #tpu.memory_space<vmem>>, vector<64x32xf32>
    %cst_10 = arith.constant dense<0.000000e+00> : vector<8x32xf32>
    %15 = tpu.matmul %13, %14, %cst_10 {dimension_numbers = #tpu.dot_dimension_numbers<[1], [0], [0], [1], [0, 0, 1, 1], [], []>} : vector<8x64xf32>, vector<64x32xf32>, vector<8x32xf32> -> vector<8x32xf32>
    %c0_11 = arith.constant 0 : index
    %c0_12 = arith.constant 0 : index
    %16 = vector.load %arg5[%c0_11, %c0_12] : memref<1x32xf32, #tpu.memory_space<vmem>>, vector<1x32xf32>
    %17 = vector.broadcast %16 : vector<1x32xf32> to vector<8x32xf32>
    %18 = arith.addf %15, %17 : vector<8x32xf32>
    %c0_13 = arith.constant 0 : index
    %c0_14 = arith.constant 0 : index
    %19 = vector.load %arg6[%c0_13, %c0_14] : memref<8x32xf32, #tpu.memory_space<vmem>>, vector<8x32xf32>
    tpu.vector_store %arg6[%c0_13, %c0_14], %18 {strides = array<i32>} : memref<8x32xf32, #tpu.memory_space<vmem>>, vector<8x32xf32>,
    return
  }
  func.func @transform_0(%arg0: i32) -> (i32, i32) {
    %c0_i32 = arith.constant 0 : i32
    %c0_i32_0 = arith.constant 0 : i32
    return %arg0, %c0_i32 : i32, i32
  }
  func.func @transform_1(%arg0: i32) -> (i32, i32) {
    %c0_i32 = arith.constant 0 : i32
    %c0_i32_0 = arith.constant 0 : i32
    %c0_i32_1 = arith.constant 0 : i32
    return %c0_i32, %c0_i32_0 : i32, i32
  }
  func.func @transform_2(%arg0: i32) -> (i32, i32) {
    %c0_i32 = arith.constant 0 : i32
    %c0_i32_0 = arith.constant 0 : i32
    %c0_i32_1 = arith.constant 0 : i32
    return %c0_i32, %c0_i32_0 : i32, i32
  }
  func.func @transform_3(%arg0: i32) -> (i32, i32) {
    %c0_i32 = arith.constant 0 : i32
    %c0_i32_0 = arith.constant 0 : i32
    %c0_i32_1 = arith.constant 0 : i32
    return %c0_i32, %c0_i32_0 : i32, i32
  }
  func.func @transform_4(%arg0: i32) -> (i32, i32) {
    %c0_i32 = arith.constant 0 : i32
    %c0_i32_0 = arith.constant 0 : i32
    %c0_i32_1 = arith.constant 0 : i32
    return %c0_i32, %c0_i32_0 : i32, i32
  }
  func.func @transform_5(%arg0: i32) -> (i32, i32) {
    %c0_i32 = arith.constant 0 : i32
    %c0_i32_0 = arith.constant 0 : i32
    return %arg0, %c0_i32 : i32, i32
  }
}

</mosaic_0001>

<bundles_post_ra>
// kernel: tpu_custom_call.1
= control target key start
LH: loop header
LB: loop body
LE: loop exit
PB: predicated region body
PF: predicated region fallthrough
CT: control target
= control target key end

     0   :  { %10 = vsyncpa [#allocation3], 0  ;;  %s688_s0 = inlined_call_operand.vmem [shape: f32[16,32], index: 0, kind: input, shape index: {}]   ;;  %s689_s1 = inlined_call_operand.vmem [shape: f32[32,64], index: 1, kind: input, shape index: {}]   ;;  %s690_s2 = inlined_call_operand.vmem [shape: f32[1,64], index: 2, kind: input, shape index: {}]   ;;  %s691_s3 = inlined_call_operand.vmem [shape: f32[64,32], index: 3, kind: input, shape index: {}]   ;;  %s692_s4 = inlined_call_operand.vmem [shape: f32[1,32], index: 4, kind: input, shape index: {}]   ;;  %s693_s5 = inlined_call_operand.hbm [shape: f32[16,32], index: 5, kind: output, shape index: {}]  }
   0x1   :  { %12 = vsyncpa [#allocation3 + $0x1], 0  ;;  %s559_s18 = smov 0   ;;  %s561_s19 = smov 0  }
   0x2   :  { %s563_s20 = smov 0   ;;  %s565_s21 = smov 0  }
   0x3 LB: > { %s580_s22 = sadd.s32 4294967295, %s527_s21   ;;  %s409_s23 = sadd.s32 4294967294, %s527_s21   ;;  %s527_s21 = sphi %s565_s21, %s699_s21   ;;  %s523_s20 = sphi %s563_s20, %s698_s20   ;;  %s519_s19 = sphi %s561_s19, %s697_s19   ;;  %s515_s18 = sphi %s559_s18, %s696_s18  }
   0x4   : > { %s584_s24 = sadd.s32 1, %s527_s21   ;;  %s135_s25 = sadd.s32 1, %s523_s20 }
   0x5   : > { %s132_s26 = ssub.s32 %s527_s21, %s584_s24  ;;  %p145_p0 = scmp.ne.s32.totalorder %s523_s20, %s519_s19 }
   0x6   : > { %p133_p1 = scmp.eq.s32.totalorder %s132_s26, 0  ;;  %p146_p2 = scmp.eq.s32.totalorder %s580_s22, 1 }
   0x7   : > { %p151_p3 = scmp.ne.s32.totalorder %s519_s19, %s515_s18  ;;  %p152_p4 = scmp.eq.s32.totalorder %s409_s23, 1 }
   0x8   : > { %s595_s27 = scalar_select %p133_p1, %s523_s20, %s135_s25  }
   0x9   : > { %p597_p5 = por %p146_p2, %p145_p0  ;;  %p601_p6 = por %p152_p4, %p151_p3 }
   0xa   : > { %p412_p7 = scmp.ge.s32.totalorder %s527_s21, 1  ;;  %p189_p8 = scmp.lt.s32.totalorder %s527_s21, 3 }
   0xc   : > { %p190_p9 = pnand %p412_p7, %p189_p8 }
   0xd   : > { %p216_p10 = scmp.lt.s32.totalorder (!%p190_p9), %s580_s22, 1  ;;  %s213_s26 = sand.u32 (!%p190_p9), 1, %s519_s19  }
   0xe   : > { %193 = sbr.rel (%p190_p9) target bundleno = 337 (0x151), region = 40  ;;  %s413_s30 = sshll.u32 (!%p190_p9), %s213_s26, 3 }
   0xf   : > { %s419_s6 = sshll.u32 (!%p190_p9), %s580_s22, 3  ;;  %s215_s12 = scalar_lea.vmem (!%p190_p9), [#allocation2], %s413_s30 }
  0x10   : > { %s345_s9 = scalar_lea.hbm (!%p190_p9), %s693_s5, %s419_s6  ;;  %s347_s13 = sshll.u32 (!%p190_p9), %s215_s12, 4  ;;  %s348_s13 = int_to_ptr.vmem [resolvable:$true] %s347_s13 }
  0x11   : > { %s335_s15 = scalar_lea.sflag (!%p190_p9), [#allocation3], %s213_s26  ;;  %s485_s25 = scalar_lea.hbm (!%p190_p9), %s693_s5, 16 }
  0x13   : > { %v224_v0 = vld [vmem:[%s689_s1 + $0x18] sm:$0xff]  ;;  %v223_v1 = vld [vmem:[%s689_s1 + $0x10] sm:$0xff]  ;;  %v222_v2 = vld [vmem:[%s689_s1 + $0x8] sm:$0xff]  ;;  %s217_s11 = scalar_select %p216_p10, %s580_s22, 1  ;;  %vm229_vm0 = vcmask 261120   ;;  %vm309_vm5 = vcmask 523264  }
  0x14   : > { %245 = vmatpush.msra.mxu0 %v224_v0  ;;  %v221_v3 = vld [vmem:[%s689_s1] sm:$0xff]  ;;  %v304_v11 = vld [vmem:[%s691_s3 + $0x38] sm:$0xff]  ;;  %v303_v14 = vld [vmem:[%s691_s3 + $0x30] sm:$0xff] }
  0x15   : > { %s414_s14 = sshll.u32 %s217_s11, 3  ;;  %v461_v5 = vld [vmem:[%s690_s2] ss:$0 sm:$0xff]  ;;  %321 = vmatpush.msra.mxu1 %v304_v11  ;;  %v302_v17 = vld [vmem:[%s691_s3 + $0x28] sm:$0xff]  ;;  %v300_v21 = vld [vmem:[%s691_s3 + $0x18] sm:$0xff] }
  0x16   : > { %246 = vmatpush.msra.mxu0 %v223_v1  ;;  %s219_s17 = scalar_lea.vmem %s688_s0, %s414_s14  ;;  %v301_v20 = vld [vmem:[%s691_s3 + $0x20] sm:$0xff]  ;;  %v299_v23 = vld [vmem:[%s691_s3 + $0x10] sm:$0xff]  ;;  %v298_v26 = vld [vmem:[%s691_s3 + $0x8] sm:$0xff]  ;;  %s349_s14 = sshll.u32 %s345_s9, 4  ;;  %s350_s14 = int_to_ptr.hbm [resolvable:$true] %s349_s14 }
  0x17   : > { %v220_v4 = vld [vmem:[%s219_s17] sm:$0xff]  ;;  %322 = vmatpush.msra.mxu1 %v303_v14  ;;  %s479_s22 = sshra.s32 %s350_s14, 4  ;;  %s480_s22 = int_to_ptr.hbm [resolvable:$true] %s479_s22 }
  0x18   : > { %247 = vmatpush.msra.mxu0 %v222_v2  ;;  %v297_v28 = vld [vmem:[%s691_s3] sm:$0xff]  ;;  %s481_s16 = scalar_lea.hbm %s480_s22, 8  ;;  %p486_p0 = scmp.lt.s32.totalorder %s480_s22, %s693_s5 }
  0x19   : > { %323 = vmatpush.msra.mxu1 %v302_v17  ;;  %v462_v55 = vld [vmem:[%s692_s4] ss:$0 sm:$0xff]  ;;  %p482_p11 = scmp.ne.s32.totalorder %s480_s22, %s481_s16  ;;  %p487_p1 = scmp.lt.s32.totalorder %s485_s25, %s481_s16 }
  0x1a   : > { %248 = vmatpush.msra.mxu0 %v221_v3 }
  0x1b   : > { %415 = vmatmul.msk.f32.vlgmr.msra.gmra.mxu0 %vm229_vm0, %v220_v4  ;;  %324 = vmatpush.msra.mxu1 %v301_v20  ;;  %p483_p12 = pnand %p482_p11, %p597_p5  ;;  %p488_p2 = por %p487_p1, %p486_p0 }
  0x1d   : > { %325 = vmatpush.msra.mxu1 %v300_v21  ;;  %p484_p13 = pneg %p483_p12 }
  0x1f   : > { %326 = vmatpush.msra.mxu1 %v299_v23  ;;  %p489_p3 = pnand %p488_p2, %p484_p13 }
  0x21   : > { %327 = vmatpush.msra.mxu1 %v298_v26 }
  0x23   : > { %328 = vmatpush.msra.mxu1 %v297_v28 }
  0x98   : > { %v250_v6 = vpop.f32.mrf.mxu0 }
  0x99   : > { %v251_v7 = vadd.f32 %v461_v5, %v250_v6 }
  0x9b   : > { %v254_v8 = vmul.f32 0.70710677, %v251_v7  ;;  %v253_v52 = vmul.f32 0.5, %v251_v7 }
  0x9d   : > { %v255_v9 = vmul.f32 %v254_v8, %v254_v8 }
  0x9f   : > { %v256_v10 = vmin.f32 %v255_v9, 16.0 }
  0xa1   : > { %v257_v12 = vmul.f32 2.1237322e-06, %v256_v10  ;;  %v268_v13 = vmul.f32 3.8918573e-05, %v256_v10 }
  0xa3   : > { %v258_v15 = vadd.f32 0.00028619796, %v257_v12  ;;  %v269_v16 = vadd.f32 0.001143296, %v268_v13 }
  0xa5   : > { %v259_v18 = vmul.f32 %v258_v15, %v256_v10  ;;  %v270_v19 = vmul.f32 %v269_v16, %v256_v10 }
  0xa7   : > { %v271_v22 = vadd.f32 0.014752088, %v270_v19  ;;  %v260_v24 = vadd.f32 0.0036580483, %v259_v18 }
  0xa9   : > { %v272_v25 = vmul.f32 %v271_v22, %v256_v10  ;;  %v261_v29 = vmul.f32 %v260_v24, %v256_v10 }
  0xab   : > { %v273_v27 = vadd.f32 0.112945676, %v272_v25  ;;  %v262_v32 = vadd.f32 0.05243302, %v261_v29 }
  0xad   : > { %v274_v30 = vmul.f32 %v273_v27, %v256_v10  ;;  %v263_v35 = vmul.f32 %v262_v32, %v256_v10 }
  0xaf   : > { %v275_v31 = vadd.f32 0.4994258, %v274_v30  ;;  %v264_v36 = vadd.f32 0.18741608, %v263_v35 }
  0xb1   : > { %v276_v33 = vmul.f32 %v275_v31, %v256_v10  ;;  %v265_v38 = vmul.f32 %v264_v36, %v256_v10 }
  0xb3   : > { %v277_v34 = vadd.f32 1.0, %v276_v33  ;;  %v266_v42 = vadd.f32 1.1283791, %v265_v38 }
  0xb5   : > { %463 = vrcp.f32 %v277_v34  ;;  %v289_v41 = vand.u32 2147483648, %v277_v34  ;;  %v287_v44 = vand.u32 2147483647, %v277_v34  ;;  %vm283_vm2 = vweird.f32 %v277_v34 }
  0xb6   : > { %v267_v47 = vmul.f32 %v266_v42, %v254_v8 }
  0xb7   : > { %v290_v46 = vor.u32 1.1754944e-38, %v289_v41  ;;  %vm288_vm4 = vcmp.eq.f32.partialorder %v287_v44, 8.507059e+37 }
  0xbb   : > { %v464_v37 = vpop.eup %463 }
  0xbc   : > { %v279_v39 = vmul.f32 %v464_v37, %v277_v34  ;;  %vm284_vm1 = vweird.f32 %v464_v37 }
  0xbd   : > { %vm285_vm3 = vmor %vm283_vm2, %vm284_vm1 }
  0xbe   : > { %v280_v40 = vsub.f32 1.0, %v279_v39 }
  0xc0   : > { %v281_v43 = vmul.f32 %v464_v37, %v280_v40 }
  0xc2   : > { %v282_v45 = vadd.f32 %v464_v37, %v281_v43 }
  0xc4   : > { %v286_v48 = vsel %vm285_vm3, %v464_v37, %v282_v45 }
  0xc5   : > { %v291_v49 = vsel %vm288_vm4, %v290_v46, %v286_v48 }
  0xc6   : > { %v292_v50 = vmul.f32 %v291_v49, %v267_v47 }
  0xc8   : > { %v416_v51 = vclamps-f32 %v292_v50, 1.0 }
  0xca   : > { %v295_v53 = vadd.f32 1.0, %v416_v51 }
  0xcc   : > { %v296_v54 = vmul.f32 %v295_v53, %v253_v52 }
  0xce   : > { %417 = vmatmul.msk.f32.vlgmr.msra.gmra.mxu1 %vm309_vm5, %v296_v54 }
 0x14b   : > { %v330_v56 = vpop.f32.mrf.mxu1 }
 0x14c   : > { %v331_v57 = vadd.f32 %v462_v55, %v330_v56 }
 0x14e   : > { %333 = vst.msk [vmem:[%s215_s12] sm:$0xff] %vm229_vm0, %v331_v57 }
 0x14f   : > { %492 = shalt.err (!%p489_p3)
}
 0x150   : > { %422 = dma.vmem_to_hbm [thread:$0]  (%p597_p5), %s348_s13, 128, %s350_s14, %s335_s15  }
 0x151 PF: > { %p428_p4 = scmp.ge.s32.totalorder %s527_s21, 2  ;;  %s361_s26 = sand.u32 1, %s515_s18  }
 0x152   : > { %s362_s7 = scalar_lea.sflag [#allocation3], %s361_s26 }
 0x153   : > { %p425_p7 = pnand %p428_p4, %p601_p6 }
 0x155   : > { %p426_p8 = pneg %p425_p7 }
 0x157   : > { %510 = dma.done.wait (%p426_p8), %s362_s7, 128  }
 0x158   : > { %512 = vsyncadd (%p426_p8), %s362_s7, 4294967168  ;;  %p15_p9 = scmp.ge.s32.totalorder %s584_s24, 4   ;;  %s696_s18 = smov %s519_s19 }
 0x159   : > { %s697_s19 = smov %s523_s20  ;;  %s698_s20 = smov %s595_s27 }
 0x15a   : > { %s699_s21 = smov %s584_s24  ;;  %17 = sbr.rel (!%p15_p9) target bundleno = 3 (0x3), region = 75 }
 0x15f   :  { %368 = vsyncpa [#allocation3], 1 }
 0x160   :  { %370 = vsyncpa [#allocation3 + $0x1], 1 }

</bundles_post_ra>
